<compile_context>
chip_gen: v6e
topology: v6e:2x2x1
jax: 0.10.0
libtpu: 0.0.40
codegen_flags: <defaults>
</compile_context>

<pallas_src>
import jax
import jax.numpy as jnp
from jax.experimental import pallas as pl
from jax.experimental.pallas import tpu as pltpu


def _sse_kernel(x_ref, w_ref, b_ref, o_ref):
    """One grid step over a (NB, C, T) slab.

    x_ref : (NB, C, T)  input tile, native dtype (VMEM)
    w_ref : (1, C)      1x1-conv weight, native dtype (VMEM)
    b_ref : (1,)        conv bias, float32 (SMEM)
    o_ref : (NB, C, T)  output tile, native dtype (VMEM)
    """
    w = w_ref[...]          # (1, C), native dtype
    b = b_ref[0]            # f32 scalar from SMEM
    nb = x_ref.shape[0]     # static, capped at 8 by _choose_tiles
    for i in range(nb):     # <= 8 tiny iterations; nothing live across them
        xi = x_ref[i]       # (C, T), native dtype
        # 1x1 conv, single output channel: (1,C)@(C,T) with f32 accumulation.
        s = jnp.dot(w, xi, preferred_element_type=jnp.float32) + b   # (1, T) f32
        gate = jax.nn.sigmoid(s)                                      # (1, T) f32
        # Broadcast-multiply the gate over channels in the native dtype.
        o_ref[i] = xi * gate.astype(xi.dtype)


def _vmem_config():
    """Return (pipeline-buffer budget, scoped-VMEM limit), generation-aware."""
    cap = 64 << 20          # conservative default: v7x has 64 MiB per TensorCore
    try:
        cap = int(pltpu.get_tpu_info().vmem_capacity_bytes)
    except Exception:
        pass                # interpret mode / older API: keep the safe default
    # (input + output) x 2 double buffers; keep well under every generation's
    # physical VMEM (v5e/v6e 128 MiB, v7x 64 MiB per TC).
    budget = min(24 << 20, cap // 3)
    # Scoped limit we request from Mosaic: budget + headroom for weight/scratch.
    limit = min(cap // 2, budget + (8 << 20))
    return budget, limit


def _choose_tiles(N, C, HW, itemsize, budget_bytes):
    """Pick (nb, t, hw_pad): batch-group size, spatial tile, padded HW extent."""
    # Sublane tile for this dtype: 8 (f32) / 16 (bf16) / 32 (int8).  The real
    # VMEM footprint of a (nb, C, t) block rounds C up to this and t up to 128.
    sub = max(8, 32 // max(1, itemsize))
    c_pad = ((C + sub - 1) // sub) * sub

    def lane_pad(t):
        return ((t + 127) // 128) * 128

    def tile_bytes(nb, t):
        # (input + output) x 2 pipeline buffers, sublane/lane padding included.
        return 4 * nb * c_pad * lane_pad(t) * itemsize

    # A ~2 MiB per-step input slab hides the ~0.35 us fixed per-grid-step
    # overhead at every generation's HBM bandwidth.
    target_slab = 2 << 20
    nb_cap = 8              # keeps the in-kernel per-batch loop tiny

    divisors = [d for d in range(1, N + 1) if N % d == 0]

    if tile_bytes(1, HW) <= budget_bytes:
        # Whole spatial extent per step: longest, contiguous DMA rows.
        t, hw_pad = HW, HW
        nb = 1
        for d in divisors:
            if (d <= nb_cap
                    and tile_bytes(d, t) <= budget_bytes
                    and d * c_pad * lane_pad(t) * itemsize <= target_slab):
                nb = d
        # Guarantee >= 2 grid steps so both v7x TensorCores get work
        # (harmless on 1-TC v5e/v6e: one extra ~0.35 us step).
        if N // nb < 2:
            if N > 1:
                nb = max(d for d in divisors if d <= N // 2)
            elif HW % 128 == 0 and HW >= 256:
                t = max(tt for tt in range(128, HW // 2 + 1, 128) if HW % tt == 0)
    else:
        # Even a single batch element is over budget: split the spatial axis.
        nb = 1
        if HW % 128 == 0:
            # Largest multiple-of-128 tile that divides HW and fits the budget.
            cands = [tt for tt in range(128, HW + 1, 128)
                     if HW % tt == 0 and tile_bytes(1, tt) <= budget_bytes]
            # 128-lane floor: only unreachable for absurd C; vmem_limit has headroom.
            t, hw_pad = (max(cands) if cands else 128), HW
        else:
            # Ragged spatial extent over budget: pad HW up to a multiple of the
            # tile so every block is lane-dense (unmasked stores).  Padded
            # columns are zero and are sliced off by the wrapper.
            cands = [tt for tt in range(128, lane_pad(HW) + 1, 128)
                     if tile_bytes(1, tt) <= budget_bytes]
            t = max(cands) if cands else 128
            hw_pad = ((HW + t - 1) // t) * t
    return nb, t, hw_pad


def sse_forward(x, weight, bias, *, vmem_budget_bytes=None):
    """sSE forward.

    Args:
      x:      (N, C, H, W)  input feature map (NCHW, matching PyTorch).
      weight: (1, C, 1, 1)  conv weight (nn.Conv2d(planes, 1, 1)).
      bias:   (1,)          conv bias.
      vmem_budget_bytes: optional override of the pipeline-buffer budget
        (used in tests to exercise the spatial-split / padding paths).
    Returns:
      (N, C, H, W) output, same dtype as x.
    """
    N, C, H, W = x.shape
    HW = H * W

    budget, vmem_limit = _vmem_config()
    if vmem_budget_bytes is not None:
        budget = vmem_budget_bytes

    itemsize = jnp.dtype(x.dtype).itemsize
    nb, t_hw, hw_pad = _choose_tiles(N, C, HW, itemsize, budget)

    x_flat = x.reshape(N, C, HW)
    if hw_pad != HW:
        x_flat = jnp.pad(x_flat, ((0, 0), (0, 0), (0, hw_pad - HW)))

    w2d = weight.reshape(1, C).astype(x.dtype)       # native dtype for the MXU dot
    b1d = bias.reshape(1).astype(jnp.float32)        # f32 scalar in SMEM

    out_flat = pl.pallas_call(
        _sse_kernel,
        out_shape=jax.ShapeDtypeStruct((N, C, hw_pad), x.dtype),
        grid_spec=pltpu.PrefetchScalarGridSpec(
            num_scalar_prefetch=0,
            grid=(N // nb, hw_pad // t_hw),
            in_specs=[
                pl.BlockSpec((nb, C, t_hw), lambda n, s: (n, 0, s)),   # x slab
                pl.BlockSpec((1, C), lambda n, s: (0, 0)),             # weight (VMEM)
                pl.BlockSpec(memory_space=pltpu.MemorySpace.SMEM),     # bias (SMEM)
            ],
            out_specs=pl.BlockSpec((nb, C, t_hw), lambda n, s: (n, 0, s)),
        ),
        compiler_params=pltpu.CompilerParams(
            dimension_semantics=("parallel", "parallel"),
            vmem_limit_bytes=vmem_limit,
        ),
    )(x_flat, w2d, b1d)

    if hw_pad != HW:
        out_flat = out_flat[:, :, :HW]
    return out_flat.reshape(N, C, H, W)


def sse_reference(x, weight, bias):
    """Pure-JAX reference matching the PyTorch module."""
    w = weight.reshape(1, -1, 1, 1).astype(jnp.float32)
    s = jnp.sum(x.astype(jnp.float32) * w, axis=1, keepdims=True) + bias.astype(jnp.float32)
    gate = jax.nn.sigmoid(s)
    return (x.astype(jnp.float32) * gate).astype(x.dtype)


def _run_case(key, shape, dtype, atol, rtol, vmem_budget_bytes=None):
    kx, kw, kb = jax.random.split(key, 3)
    N, C, H, W = shape
    x = jax.random.normal(kx, shape, dtype=jnp.float32).astype(dtype)
    weight = jax.random.normal(kw, (1, C, 1, 1), dtype=jnp.float32) * 0.1
    bias = jax.random.normal(kb, (1,), dtype=jnp.float32) * 0.1

    out = jax.block_until_ready(
        sse_forward(x, weight, bias, vmem_budget_bytes=vmem_budget_bytes))
    ref = sse_reference(x, weight, bias)

    assert out.shape == shape
    assert out.dtype == dtype
    assert jnp.allclose(out.astype(jnp.float32), ref.astype(jnp.float32),
                        atol=atol, rtol=rtol), f"mismatch for shape={shape} dtype={dtype}"


if __name__ == "__main__":
    key = jax.random.PRNGKey(0)
    k0, k1, k2, k3, k4 = jax.random.split(key, 5)

    # Main small case (matches the module's expected small shapes): grid (2, 1).
    _run_case(k0, (2, 4, 16, 16), jnp.float32, atol=1e-5, rtol=1e-5)
    # Ragged spatial extent (H*W not a multiple of 128) -> full-extent lane block.
    _run_case(k1, (2, 4, 10, 12), jnp.float32, atol=1e-5, rtol=1e-5)
    # bf16 path: native-dtype multiply, f32 gate accumulation.
    _run_case(k2, (2, 8, 16, 24), jnp.bfloat16, atol=5e-2, rtol=5e-2)
    # Forced tiny budget -> over-budget divisor split of a lane-dense HW (t=256).
    _run_case(k3, (2, 8, 16, 32), jnp.float32, atol=1e-5, rtol=1e-5,
              vmem_budget_bytes=32 << 10)
    # Forced tiny budget + ragged HW -> zero-pad to a multiple of 128 and tile.
    _run_case(k4, (1, 4, 20, 20), jnp.float32, atol=1e-5, rtol=1e-5,
              vmem_budget_bytes=16 << 10)

    print("KERNEL_OK")
</pallas_src>

<mosaic_0001>
module attributes {stable_mosaic.version = 11 : i64} {
  func.func @_sse_kernel(%arg0: i32, %arg1: i32, %arg2: memref<1x4x256xf32, #tpu.memory_space<vmem>>, %arg3: memref<1x4xf32, #tpu.memory_space<vmem>>, %arg4: memref<1xf32, #tpu.memory_space<smem>>, %arg5: memref<1x4x256xf32, #tpu.memory_space<vmem>>) attributes {dimension_semantics = [#tpu.dimension_semantics<parallel>, #tpu.dimension_semantics<parallel>], iteration_bounds = array<i64: 2, 1>, scalar_prefetch = 0 : i64, scratch_operands = 0 : i64, tpu.core_type = #tpu.core_type<tc>, window_params = [{transform_indices = @transform_0, window_bounds = array<i64: 1, 4, 256>}, {pipeline_mode = #tpu.pipeline_mode<synchronous>, transform_indices = @transform_1, window_bounds = array<i64: 1, 4>}, {transform_indices = @transform_2, window_bounds = array<i64: 1>}, {transform_indices = @transform_3, window_bounds = array<i64: 1, 4, 256>}]} {
    %c0 = arith.constant 0 : index
    %c0_0 = arith.constant 0 : index
    %0 = vector.load %arg3[%c0, %c0_0] : memref<1x4xf32, #tpu.memory_space<vmem>>, vector<1x4xf32>
    %c0_1 = arith.constant 0 : index
    %1 = memref.load %arg4[%c0_1] : memref<1xf32, #tpu.memory_space<smem>>
    %c0_2 = arith.constant 0 : index
    %c0_3 = arith.constant 0 : index
    %c0_4 = arith.constant 0 : index
    %2 = vector.load %arg2[%c0_2, %c0_3, %c0_4] : memref<1x4x256xf32, #tpu.memory_space<vmem>>, vector<1x4x256xf32>
    %3 = vector.shape_cast %2 : vector<1x4x256xf32> to vector<4x256xf32>
    %cst = arith.constant dense<0.000000e+00> : vector<1x256xf32>
    %4 = tpu.matmul %0, %3, %cst {dimension_numbers = #tpu.dot_dimension_numbers<[1], [0], [0], [1], [0, 0, 1, 1], [], []>} : vector<1x4xf32>, vector<4x256xf32>, vector<1x256xf32> -> vector<1x256xf32>
    %5 = vector.broadcast %1 : f32 to vector<1x256xf32>
    %6 = arith.addf %4, %5 : vector<1x256xf32>
    %7 = arith.negf %6 : vector<1x256xf32>
    %8 = math.exp %7 : vector<1x256xf32>
    %cst_5 = arith.constant 1.000000e+00 : f32
    %9 = vector.broadcast %cst_5 : f32 to vector<1x256xf32>
    %10 = arith.addf %9, %8 : vector<1x256xf32>
    %11 = arith.divf %9, %10 : vector<1x256xf32>
    %12 = vector.broadcast %11 : vector<1x256xf32> to vector<4x256xf32>
    %13 = arith.mulf %3, %12 : vector<4x256xf32>
    %c0_6 = arith.constant 0 : index
    %c0_7 = arith.constant 0 : index
    %c0_8 = arith.constant 0 : index
    %14 = vector.load %arg5[%c0_6, %c0_7, %c0_8] : memref<1x4x256xf32, #tpu.memory_space<vmem>>, vector<1x4x256xf32>
    %15 = vector.shape_cast %14 : vector<1x4x256xf32> to vector<4x256xf32>
    %16 = vector.shape_cast %13 : vector<4x256xf32> to vector<1x4x256xf32>
    tpu.vector_store %arg5[%c0_6, %c0_7, %c0_8], %16 {strides = array<i32>} : memref<1x4x256xf32, #tpu.memory_space<vmem>>, vector<1x4x256xf32>,
    return
  }
  func.func @transform_0(%arg0: i32, %arg1: i32) -> (i32, i32, i32) {
    %c0_i32 = arith.constant 0 : i32
    %c0_i32_0 = arith.constant 0 : i32
    return %arg0, %c0_i32, %arg1 : i32, i32, i32
  }
  func.func @transform_1(%arg0: i32, %arg1: i32) -> (i32, i32) {
    %c0_i32 = arith.constant 0 : i32
    %c0_i32_0 = arith.constant 0 : i32
    %c0_i32_1 = arith.constant 0 : i32
    return %c0_i32, %c0_i32_0 : i32, i32
  }
  func.func @transform_2(%arg0: i32, %arg1: i32) -> i32 {
    %c0_i32 = arith.constant 0 : i32
    %c0_i32_0 = arith.constant 0 : i32
    return %c0_i32 : i32
  }
  func.func @transform_3(%arg0: i32, %arg1: i32) -> (i32, i32, i32) {
    %c0_i32 = arith.constant 0 : i32
    %c0_i32_0 = arith.constant 0 : i32
    return %arg0, %c0_i32, %arg1 : i32, i32, i32
  }
}

</mosaic_0001>

<bundles_post_ra>
// kernel: tpu_custom_call.1
= control target key start
LH: loop header
LB: loop body
LE: loop exit
PB: predicated region body
PF: predicated region fallthrough
CT: control target
= control target key end

     0   :  { %s792_s0 = inlined_call_operand.hbm [shape: f32[2,4,256], index: 0, kind: input, shape index: {}]   ;;  %s793_s1 = inlined_call_operand.vmem [shape: f32[1,4], index: 1, kind: input, shape index: {}]   ;;  %s794_s2 = inlined_call_operand.<no memory space> [shape: f32[1], index: 2, kind: input, shape index: {}]   ;;  %s795_s3 = inlined_call_operand.hbm [shape: f32[2,4,256], index: 3, kind: output, shape index: {}]  }
   0x1   :  { %8 = sst [smem:[#allocation2]] %s794_s2 }
   0x2   :  { %9 = vsyncpa [#allocation4], 0 }
   0x3   :  { %11 = vsyncpa [#allocation4 + $0x1], 0 }
   0x4   :  { %12 = vsyncpa [#allocation5], 0 }
   0x5   :  { %14 = vsyncpa [#allocation5 + $0x1], 0  ;;  %s651_s14 = smov 0   ;;  %s653_s15 = smov 0  }
   0x6   :  { %s655_s16 = smov 0   ;;  %s657_s17 = smov 0  }
   0x7   :  { %s659_s18 = smov 0   ;;  %s661_s19 = smov 0  }
   0x8 LB: > { %s421_s2 = sadd.s32 4294967295, %s623_s19   ;;  %s422_s20 = sadd.s32 4294967294, %s623_s19   ;;  %s623_s19 = sphi %s661_s19, %s20_s19   ;;  %s619_s18 = sphi %s659_s18, %s807_s18   ;;  %s615_s17 = sphi %s657_s17, %s806_s17   ;;  %s611_s16 = sphi %s655_s16, %s805_s16   ;;  %s607_s15 = sphi %s653_s15, %s804_s15   ;;  %s603_s14 = sphi %s651_s14, %s803_s14  }
   0x9   : > { %s32_s21 = sadd.s32 1, %s619_s18  ;;  %s41_s22 = sadd.s32 1, %s611_s16 }
   0xa   : > { %p34_p0 = scmp.ge.s32.totalorder %s32_s21, 2  ;;  %p48_p1 = scmp.ne.s32.totalorder %s611_s16, %s607_s15 }
   0xb   : > { %p49_p2 = scmp.eq.s32.totalorder %s623_s19, 0  ;;  %p54_p3 = scmp.ne.s32.totalorder %s607_s15, %s603_s14 }
   0xc   : > { %s809_s21 = smov (%p34_p0, %s32_s21), 0  ;;  %p55_p5 = scmp.eq.s32.totalorder %s421_s2, 0 }
   0xd   : > { %p692_p4 = por %p49_p2, %p48_p1  ;;  %s36_s24 = ssub.s32 %s619_s18, %s809_s21 }
   0xe   : > { %p122_p6 = scmp.eq.s32.totalorder %s421_s2, 1  ;;  %p39_p7 = scmp.eq.s32.totalorder %s36_s24, 0 }
   0xf   : > { %p698_p8 = por %p55_p5, %p54_p3  ;;  %p128_p10 = scmp.eq.s32.totalorder %s422_s20, 1 }
  0x10   : > { %p702_p9 = por %p122_p6, %p48_p1  ;;  %p455_p13 = scmp.lt.s32.totalorder %s623_s19, 2 }
  0x11   : > { %s707_s27 = scalar_select %p39_p7, %s611_s16, %s41_s22  }
  0x12   : > { %p709_p11 = por %p128_p10, %p54_p3  ;;  %s154_s29 = sand.u32 1, %s611_s16  }
  0x13   : > { %s425_s30 = sshll.u32 %s154_s29, 3  ;;  %s441_s4 = sshll.u32 %s619_s18, 7 }
  0x14   : > { %s799_s28 = scalar_select %p709_p11, 1, 0 }
  0x15   : > { %s166_s7 = scalar_lea.hbm %s792_s0, %s441_s4  ;;  %s158_s8 = scalar_lea.vmem [#allocation3], %s425_s30 }
  0x16   : > { %s168_s9 = sshll.u32 %s158_s8, 4  ;;  %p722_p0 = pnand %p455_p13, %p692_p4  ;;  %s169_s9 = int_to_ptr.vmem [resolvable:$true] %s168_s9 }
  0x17   : > { %p428_p1 = scmp.ge.s32.totalorder %s623_s19, 1  ;;  %p173_p2 = scmp.lt.s32.totalorder %s623_s19, 3 }
  0x18   : > { %s155_s11 = scalar_lea.sflag [#allocation4], %s154_s29  ;;  %p517_p3 = pneg %p722_p0 }
  0x19   : > { %s528_s12 = scalar_lea.vmem %s169_s9, 128  ;;  %s625_s13 = smov [#allocation3]  }
  0x1a   : > { %p529_p5 = scmp.ne.s32.totalorder %s169_s9, %s528_s12  ;;  %s533_s2 = sshll.u32 %s625_s13, 4  ;;  %s534_s2 = int_to_ptr.vmem [resolvable:$false] %s533_s2 }
  0x1b   : > { %s535_s20 = scalar_lea.vmem %s534_s2, 256  ;;  %p536_p10 = scmp.lt.s32.totalorder %s169_s9, %s534_s2 }
  0x1c   : > { %p531_p6 = pnand %p529_p5, %p517_p3  ;;  %p537_p12 = scmp.lt.s32.totalorder %s535_s20, %s528_s12 }
  0x1e   : > { %p532_p7 = pneg %p531_p6  ;;  %p538_p4 = por %p537_p12, %p536_p10 }
  0x20   : > { %p539_p13 = pnand %p538_p4, %p532_p7 }
  0x22   : > { %542 = shalt.err (!%p539_p13)
}
  0x23   : > { %450 = dma.hbm_to_vmem [thread:$0]  (!%p722_p0), %s166_s7, 128, %s169_s9, %s155_s11  }
  0x24   : > { %p174_p11 = pnand %p428_p1, %p173_p2 }
  0x25   : > { %s737_s22 = sand.u32 (!%p174_p11), 1, %s607_s15  }
  0x26   : > { %177 = sbr.rel (%p174_p11) target bundleno = 297 (0x129), region = 32  ;;  %s429_s23 = sshll.u32 (!%p174_p11), %s737_s22, 3 }
  0x27   : > { %s180_s24 = scalar_lea.sflag (!%p174_p11), [#allocation4], %s737_s22  ;;  %s183_s29 = scalar_lea.vmem (!%p174_p11), [#allocation3], %s429_s23 }
  0x2b   : > { %594 = dma.done.wait (%p698_p8), %s180_s24, 128  }
  0x2c   : > { %596 = vsyncadd (%p698_p8), %s180_s24, 4294967168  ;;  %v626_v0 = vmov 0.0   ;;  %v210_v1 = vld [vmem:[%s183_s29] sm:$0xff]  ;;  %vm218_vm0 = vcmask 1043456   ;;  %vm214_vm1 = vcmask 31744   ;;  %s209_s5 = sld [smem:[#allocation2]]  ;;  %v306_v15 = vlaneseq }
  0x2d   : > { %287 = vmatprep.mubr.f32.mxu0 %v626_v0  ;;  %v213_v2 = vcombine.high %v210_v1, %v210_v1  ;;  %v208_v3 = vld [vmem:[%s793_s1] sm:$0x1]  ;;  %s442_s25 = sshll.u32 %s615_s17, 7  ;;  %s205_s6 = scalar_lea.vmem [#allocation6], %s429_s23 }
  0x2e   : > { %v307_v16 = vshrl.u32 %v306_v15, 7  ;;  %s337_s7 = sshll.u32 %s205_s6, 4  ;;  %s335_s10 = scalar_lea.hbm %s795_s3, %s442_s25  ;;  %s338_s7 = int_to_ptr.vmem [resolvable:$true] %s337_s7 }
  0x2f   : > { %431 = vmatprep.subr.msk.mxu0 %vm218_vm0, %v213_v2  ;;  %s321_s11 = scalar_lea.sflag [#allocation5], %s737_s22  ;;  %s543_s12 = scalar_lea.vmem %s338_s7, 128 }
  0x30   : > { %432 = vmatpush1.msk.msra.mxu0 %vm218_vm0, %v210_v1  ;;  %v308_v17 = vsub.s32 0, %v307_v16  ;;  %p544_p8 = scmp.ne.s32.totalorder %s338_s7, %s543_s12  ;;  %s627_s13 = smov [#allocation6]  }
  0x31   : > { %433 = vmatmul.mubr.msk.f32.vlgmr.msra.gmra.mxu0 %vm214_vm1, %v208_v3  ;;  %s547_s2 = sshll.u32 %s627_s13, 4  ;;  %s548_s2 = int_to_ptr.vmem [resolvable:$false] %s547_s2 }
  0x32   : > { %v211_v4 = vstv %s209_s5  ;;  %p545_p11 = pnand %p544_p8, %p702_p9  ;;  %s549_s17 = scalar_lea.vmem %s548_s2, 256 }
  0x33   : > { %p550_p0 = scmp.lt.s32.totalorder %s338_s7, %s548_s2  ;;  %p551_p1 = scmp.lt.s32.totalorder %s549_s17, %s543_s12 }
  0x34   : > { %p546_p12 = pneg %p545_p11 }
  0x35   : > { %p552_p2 = por %p551_p1, %p550_p0 }
  0x37   : > { %p553_p3 = pnand %p552_p2, %p546_p12 }
  0xf1   : > { %v289_v5 = vpop.f32.mrf.mxu0 }
  0xf2   : > { %v290_v6 = vadd.f32 %v289_v5, %v211_v4 }
  0xf3   : > { %v291_v7 = vpop.f32.mrf.mxu0 }
  0xf4   : > { %v434_v8 = vmul.f32 -1.442695, %v290_v6  ;;  %v292_v9 = vadd.f32 %v291_v7, %v211_v4 }
  0xf6   : > { %507 = vpow2.f32 %v434_v8  ;;  %v435_v10 = vmul.f32 -1.442695, %v292_v9 }
  0xf8   : > { %509 = vpow2.f32 %v435_v10 }
 0x103   : > { %v508_v11 = vpop.eup %507 }
 0x104   : > { %v300_v12 = vadd.f32 1.0, %v508_v11 }
 0x105   : > { %v510_v13 = vpop.eup %509 }
 0x106   : > { %511 = vrcp.f32 %v300_v12  ;;  %v301_v14 = vadd.f32 1.0, %v510_v13 }
 0x108   : > { %513 = vrcp.f32 %v301_v14 }
 0x113   : > { %v512_v18 = vpop.eup %511 }
 0x114   : > { %v309_v20 = vrot.slane %v512_v18, %v308_v17 }
 0x115   : > { %v514_v19 = vpop.eup %513 }
 0x116   : > { %v313_v21 = vrot.slane %v514_v19, %v308_v17 }
 0x118   : > { %v316_v22 = vcombine.low %v309_v20, %v313_v21 }
 0x11a   : > { %v318_v23 = vmul.f32 %v316_v22, %v210_v1 }
 0x11c   : > { %319 = vst [vmem:[%s205_s6] sm:$0xff] %v318_v23 }
 0x11d   : > { %556 = shalt.err (!%p553_p3)
}
 0x11e   : > { %s557_s20 = scalar_lea.hbm %s335_s10, 128  ;;  %s561_s24 = scalar_lea.hbm %s795_s3, 256 }
 0x11f   : > { %p558_p5 = scmp.ne.s32.totalorder %s335_s10, %s557_s20  ;;  %p562_p10 = scmp.lt.s32.totalorder %s335_s10, %s795_s3 }
 0x120   : > { %p563_p4 = scmp.lt.s32.totalorder %s561_s24, %s557_s20 }
 0x121   : > { %p559_p6 = pnand %p558_p5, %p702_p9 }
 0x122   : > { %p564_p13 = por %p563_p4, %p562_p10 }
 0x123   : > { %p560_p7 = pneg %p559_p6 }
 0x125   : > { %p565_p8 = pnand %p564_p13, %p560_p7 }
 0x127   : > { %568 = shalt.err (!%p565_p8)
}
 0x128   : > { %445 = dma.vmem_to_hbm [thread:$0]  (%p702_p9), %s338_s7, 128, %s335_s10, %s321_s11  }
 0x129 PF: > { %s349_s4 = sand.u32 1, %s603_s14   ;;  %p801_p11 = scmp.ne.s32.totalorder %s799_s28, 0 }
 0x12a   : > { %p802_p12 = scmp.ge.s32.totalorder %s623_s19, 2  ;;  %s350_s5 = scalar_lea.sflag [#allocation5], %s349_s4 }
 0x12c   : > { %p452_p0 = pnand %p802_p12, %p801_p11 }
 0x12e   : > { %p453_p1 = pneg %p452_p0 }
 0x130   : > { %598 = dma.done.wait (%p453_p1), %s350_s5, 128  }
 0x131   : > { %600 = vsyncadd (%p453_p1), %s350_s5, 4294967168  ;;  %s20_s19 = sadd.s32 1, %s623_s19   ;;  %s803_s14 = smov %s607_s15 }
 0x132   : > { %p17_p2 = scmp.ge.s32.totalorder %s20_s19, 4   ;;  %s804_s15 = smov %s611_s16 }
 0x133   : > { %s805_s16 = smov %s707_s27  ;;  %s806_s17 = smov %s619_s18 }
 0x134   : > { %s807_s18 = smov %s809_s21  ;;  %19 = sbr.rel (!%p17_p2) target bundleno = 8 (0x8), region = 77 }
 0x139   :  { %355 = vsyncpa [#allocation4], 1 }
 0x13a   :  { %357 = vsyncpa [#allocation4 + $0x1], 1 }
 0x13b   :  { %358 = vsyncpa [#allocation5], 1 }
 0x13c   :  { %360 = vsyncpa [#allocation5 + $0x1], 1 }

</bundles_post_ra>
